<compile_context>
chip_gen: v5e
topology: v5e:2x2
jax: 0.10.0
libtpu: 0.0.40
codegen_flags: <defaults>
</compile_context>

<pallas_src>
import jax
import jax.numpy as jnp
import numpy as np
from jax import lax
from jax.experimental import pallas as pl
from jax.experimental.pallas import tpu as pltpu

LANE = 128
BAG_BLOCK = 128   # bags per grid step: MXU-filling and lane-dense blocks.


def _round_up(x, m):
    return (x + m - 1) // m * m


# ---------------------------------------------------------------------------
# Kernel: one grid step handles BAG_BLOCK bags (transposed layout).
#   tok_ref    (L_pad, BAG_BLOCK) int32    per-bag padded token ids (-1 = pad)
#   invlen_ref (1, BAG_BLOCK)     f32      1/len(bag); 0 for empty/padded bags
#   embT_ref   (D_pad, V_pad)     f32/bf16 embedding table, transposed
#   w_ref      (C_pad, D_pad)     f32/bf16 fc weight (PyTorch (C, D) layout)
#   b_ref      (C_pad, 1)         f32      fc bias
#   out_ref    (C_pad, BAG_BLOCK) f32      logits, transposed
# ---------------------------------------------------------------------------
def _lang_kernel(tok_ref, invlen_ref, embT_ref, w_ref, b_ref, out_ref):
    l_pad, bb = tok_ref.shape
    v_pad = embT_ref.shape[1]

    # --- EmbeddingBag(sum) as a vocab-count matrix -------------------------
    # counts[v, b] = #{l : tok[l, b] == v}. One vectorized compare+add per
    # token position handles all BAG_BLOCK bags; pad tokens (-1) match no row.
    vocab_iota = lax.broadcasted_iota(jnp.int32, (v_pad, bb), 0)

    def count_body(l, counts):
        tok_row = tok_ref[pl.ds(l, 1), :]                 # (1, bb) sublane slice
        return counts + (tok_row == vocab_iota).astype(jnp.float32)

    counts = lax.fori_loop(0, l_pad, count_body,
                           jnp.zeros((v_pad, bb), jnp.float32))
    # TODO(synk): for very large vocabularies, chunk the vocab axis (extra grid
    # dim + VMEM accumulator) or fall back to an HBM-resident table with row
    # DMAs; the resident table + (V_pad, 128) counts are the VMEM/vreg limit.

    # --- mean + Linear as two MXU matmuls ----------------------------------
    # counts are small integers -> exact in bf16, so a bf16 table feeds the
    # MXU natively (halves VMEM residency; recommended on v7x).
    sums_t = jnp.dot(embT_ref[...], counts.astype(embT_ref.dtype),
                     preferred_element_type=jnp.float32)          # (D_pad, bb)
    mean_t = sums_t * invlen_ref[...]                             # mode='mean'
    logits_t = jnp.dot(w_ref[...], mean_t.astype(w_ref.dtype),
                       preferred_element_type=jnp.float32) + b_ref[...]
    out_ref[...] = logits_t.astype(out_ref.dtype)


def prepare_lang_model_params(emb_w, fc_w, fc_b, param_dtype=jnp.float32):
    """Pad / transpose parameters ONCE (hoisted out of the per-call path)."""
    V, D = emb_w.shape
    C = fc_w.shape[0]
    V_pad = _round_up(V, LANE)     # vocab = lane axis of emb^T / contraction dim
    D_pad = _round_up(D, 8)
    C_pad = _round_up(C, 8)
    emb_t = jnp.zeros((D_pad, V_pad), param_dtype).at[:D, :V].set(
        emb_w.T.astype(param_dtype))
    w_pad = jnp.zeros((C_pad, D_pad), param_dtype).at[:C, :D].set(
        fc_w.astype(param_dtype))
    b_pad = jnp.zeros((C_pad, 1), jnp.float32).at[:C, 0].set(
        fc_b.astype(jnp.float32))
    return dict(emb_t=emb_t, w=w_pad, b=b_pad,
                vocab_size=V, embed_dim=D, num_class=C)


def lang_model_forward(params, text, offsets, max_tokens_per_bag=None):
    """Pallas implementation of LangModel.forward(text, offsets)."""
    T = int(text.shape[0])
    B = int(offsets.shape[0])
    emb_t, w_pad, b_pad = params["emb_t"], params["w"], params["b"]
    C = params["num_class"]
    D_pad, V_pad = emb_t.shape
    C_pad = w_pad.shape[0]

    B_pad = _round_up(max(B, 1), BAG_BLOCK)
    num_chunks = B_pad // BAG_BLOCK
    # TODO(synk): with B <= BAG_BLOCK there is a single grid step, so the
    # "parallel" axis cannot shard across v7x's two TensorCores.

    # ---- per-call glue (plain XLA / host, not the hot path) ----------------
    if max_tokens_per_bag is None:
        # Static shape needs the max bag length; pass max_tokens_per_bag to
        # keep this wrapper jit-friendly.
        offs_np = np.asarray(jax.device_get(offsets)).astype(np.int64)
        lens_np = np.diff(np.concatenate([offs_np, [T]]))
        max_tokens_per_bag = int(lens_np.max()) if lens_np.size else 1
    L_pad = _round_up(max(int(max_tokens_per_bag), 1), 8)

    offs = offsets.astype(jnp.int32)
    offs_ext = jnp.concatenate(
        [offs, jnp.full((B_pad + 1 - B,), T, dtype=jnp.int32)])   # (B_pad+1,)
    lens = offs_ext[1:] - offs_ext[:-1]                            # (B_pad,)
    inv_len = jnp.where(lens > 0,
                        1.0 / jnp.maximum(lens, 1).astype(jnp.float32),
                        0.0)[None, :]                              # (1, B_pad)

    # Per-bag padded token matrix, transposed: tok_t[l, b] = text[offs[b] + l]
    # for l < len(b), else -1 (matches no vocab row -> contributes nothing).
    # NOTE: out-of-range token ids (>= vocab_size) simply match a zero-padded
    # vocab column and contribute nothing (no unchecked VMEM reads any more).
    text_safe = jnp.concatenate(
        [text.astype(jnp.int32), jnp.zeros((1,), jnp.int32)])     # gather guard
    l_idx = jnp.arange(L_pad, dtype=jnp.int32)[:, None]           # (L_pad, 1)
    valid = l_idx < lens[None, :]                                  # (L_pad, B_pad)
    gidx = jnp.where(valid, offs_ext[None, :B_pad] + l_idx, T)
    tok_t = jnp.where(valid, text_safe[gidx], -1).astype(jnp.int32)

    # ---- VMEM budget: derived from device capacity, never below the need ---
    def _nbytes(a):
        return int(a.size) * a.dtype.itemsize
    const_bytes = _nbytes(emb_t) + _nbytes(w_pad) + _nbytes(b_pad)
    block_bytes = 4 * (L_pad * BAG_BLOCK + BAG_BLOCK + C_pad * BAG_BLOCK)
    live_bytes = 4 * BAG_BLOCK * (V_pad + D_pad + C_pad)
    # Constant blocks are budgeted as double-buffered (conservative).
    # TODO(synk): single-buffer them via pipeline_mode=pl.Buffered(1) to
    # reclaim VMEM for larger resident vocabularies.
    need = 2 * const_bytes + 2 * block_bytes + live_bytes + (4 << 20)
    try:
        cap = int(getattr(pltpu.get_tpu_info(), "vmem_capacity_bytes",
                          64 << 20))
    except Exception:
        cap = 64 << 20            # conservative fallback (v7x per-core VMEM)
    usable = max(cap - (16 << 20), 16 << 20)
    vmem_limit = int(min(max(need, 32 << 20), max(usable, need)))

    out_pad = pl.pallas_call(
        _lang_kernel,
        out_shape=jax.ShapeDtypeStruct((C_pad, B_pad), jnp.float32),
        grid=(num_chunks,),
        in_specs=[
            pl.BlockSpec((L_pad, BAG_BLOCK), lambda c: (0, c)),   # tokens
            pl.BlockSpec((1, BAG_BLOCK), lambda c: (0, c)),       # 1/len
            pl.BlockSpec((D_pad, V_pad), lambda c: (0, 0)),       # emb^T (resident)
            pl.BlockSpec((C_pad, D_pad), lambda c: (0, 0)),       # fc weight
            pl.BlockSpec((C_pad, 1), lambda c: (0, 0)),           # fc bias
        ],
        out_specs=pl.BlockSpec((C_pad, BAG_BLOCK), lambda c: (0, c)),
        compiler_params=pltpu.CompilerParams(
            dimension_semantics=("parallel",),
            vmem_limit_bytes=vmem_limit),
    )(tok_t, inv_len, emb_t, w_pad, b_pad)

    return out_pad[:C, :B].T                                       # (B, C)


def _ref_forward_np(text, offsets, emb_w, fc_w, fc_b):
    """Host float64 reference: EmbeddingBag(mode='mean') + Linear."""
    text = np.asarray(text)
    offsets = np.asarray(offsets)
    E = np.asarray(emb_w, np.float64)
    W = np.asarray(fc_w, np.float64)
    bias = np.asarray(fc_b, np.float64)
    T = text.shape[0]
    B = offsets.shape[0]
    ends = np.concatenate([offsets[1:], [T]])
    mean = np.zeros((B, E.shape[1]), np.float64)
    for i in range(B):
        s, e = int(offsets[i]), int(ends[i])
        if e > s:
            mean[i] = E[text[s:e]].mean(axis=0)
    return mean @ W.T + bias


if __name__ == "__main__":
    VOCAB_SIZE, EMBEDD_DIM, HIDDEN_SIZE, NUM_CLASS = 50, 32, 64, 8
    # HIDDEN_SIZE is never used by LangModel.forward().

    key = jax.random.PRNGKey(0)
    k_emb, k_fc, k_txt = jax.random.split(key, 3)

    # init_weights(): uniform(-0.5, 0.5) for embedding & fc weight, zero bias.
    emb_w = jax.random.uniform(k_emb, (VOCAB_SIZE, EMBEDD_DIM),
                               dtype=jnp.float32, minval=-0.5, maxval=0.5)
    fc_w = jax.random.uniform(k_fc, (NUM_CLASS, EMBEDD_DIM),
                              dtype=jnp.float32, minval=-0.5, maxval=0.5)
    fc_b = jnp.zeros((NUM_CLASS,), dtype=jnp.float32)

    # 5 bags over a flat stream of 20 tokens; bag 1 is intentionally empty
    # (mean = 0 -> logits = bias, matching current torch EmbeddingBag).
    text = jax.random.randint(k_txt, (20,), 0, VOCAB_SIZE, dtype=jnp.int32)
    offsets = jnp.array([0, 5, 5, 9, 14], dtype=jnp.int32)

    params = prepare_lang_model_params(emb_w, fc_w, fc_b)   # hoisted padding
    out = lang_model_forward(params, text, offsets)
    out = jax.block_until_ready(out)

    ref = _ref_forward_np(text, offsets, emb_w, fc_w, fc_b)
    np.testing.assert_allclose(np.asarray(out, np.float64), ref,
                               rtol=1e-4, atol=1e-4)
    print("KERNEL_OK")
</pallas_src>

<mosaic_0001>
module attributes {stable_mosaic.version = 11 : i64} {
  func.func @_lang_kernel(%arg0: i32, %arg1: memref<8x128xi32, #tpu.memory_space<vmem>>, %arg2: memref<1x128xf32, #tpu.memory_space<vmem>>, %arg3: memref<32x128xf32, #tpu.memory_space<vmem>>, %arg4: memref<8x32xf32, #tpu.memory_space<vmem>>, %arg5: memref<8x1xf32, #tpu.memory_space<vmem>>, %arg6: memref<8x128xf32, #tpu.memory_space<vmem>>) attributes {dimension_semantics = [#tpu.dimension_semantics<parallel>], iteration_bounds = array<i64: 1>, scalar_prefetch = 0 : i64, scratch_operands = 0 : i64, tpu.core_type = #tpu.core_type<tc>, window_params = [{transform_indices = @transform_0, window_bounds = array<i64: 8, 128>}, {transform_indices = @transform_1, window_bounds = array<i64: 1, 128>}, {pipeline_mode = #tpu.pipeline_mode<synchronous>, transform_indices = @transform_2, window_bounds = array<i64: 32, 128>}, {pipeline_mode = #tpu.pipeline_mode<synchronous>, transform_indices = @transform_3, window_bounds = array<i64: 8, 32>}, {pipeline_mode = #tpu.pipeline_mode<synchronous>, transform_indices = @transform_4, window_bounds = array<i64: 8, 1>}, {transform_indices = @transform_5, window_bounds = array<i64: 8, 128>}]} {
    %0 = tpu.iota {dimensions = array<i32: 0>} : vector<128x128xi32>
    %cst = arith.constant 0.000000e+00 : f32
    %1 = vector.broadcast %cst : f32 to vector<128x128xf32>
    %c0_i32 = arith.constant 0 : i32
    %c8_i32 = arith.constant 8 : i32
    %2 = arith.addi %c0_i32, %c8_i32 : i32
    %c1_i32 = arith.constant 1 : i32
    %3 = scf.for %arg7 = %c0_i32 to %2 step %c1_i32 iter_args(%arg8 = %1) -> (vector<128x128xf32>)  : i32 {
      %15 = arith.index_cast %arg7 : i32 to index
      %c0_12 = arith.constant 0 : index
      %16 = vector.load %arg1[%15, %c0_12] : memref<8x128xi32, #tpu.memory_space<vmem>>, vector<1x128xi32>
      %17 = vector.broadcast %16 : vector<1x128xi32> to vector<128x128xi32>
      %18 = arith.cmpi eq, %17, %0 : vector<128x128xi32>
      %19 = arith.extui %18 : vector<128x128xi1> to vector<128x128xi32>
      %20 = arith.sitofp %19 : vector<128x128xi32> to vector<128x128xf32>
      %21 = arith.addf %arg8, %20 : vector<128x128xf32>
      scf.yield %21 : vector<128x128xf32>
    }
    %c8_i32_0 = arith.constant 8 : i32
    %c0 = arith.constant 0 : index
    %c0_1 = arith.constant 0 : index
    %4 = vector.load %arg3[%c0, %c0_1] : memref<32x128xf32, #tpu.memory_space<vmem>>, vector<32x128xf32>
    %cst_2 = arith.constant dense<0.000000e+00> : vector<32x128xf32>
    %5 = tpu.matmul %4, %3, %cst_2 {dimension_numbers = #tpu.dot_dimension_numbers<[1], [0], [0], [1], [0, 0, 1, 1], [], []>} : vector<32x128xf32>, vector<128x128xf32>, vector<32x128xf32> -> vector<32x128xf32>
    %c0_3 = arith.constant 0 : index
    %c0_4 = arith.constant 0 : index
    %6 = vector.load %arg2[%c0_3, %c0_4] : memref<1x128xf32, #tpu.memory_space<vmem>>, vector<1x128xf32>
    %7 = vector.broadcast %6 : vector<1x128xf32> to vector<32x128xf32>
    %8 = arith.mulf %5, %7 : vector<32x128xf32>
    %c0_5 = arith.constant 0 : index
    %c0_6 = arith.constant 0 : index
    %9 = vector.load %arg4[%c0_5, %c0_6] : memref<8x32xf32, #tpu.memory_space<vmem>>, vector<8x32xf32>
    %cst_7 = arith.constant dense<0.000000e+00> : vector<8x128xf32>
    %10 = tpu.matmul %9, %8, %cst_7 {dimension_numbers = #tpu.dot_dimension_numbers<[1], [0], [0], [1], [0, 0, 1, 1], [], []>} : vector<8x32xf32>, vector<32x128xf32>, vector<8x128xf32> -> vector<8x128xf32>
    %c0_8 = arith.constant 0 : index
    %c0_9 = arith.constant 0 : index
    %11 = vector.load %arg5[%c0_8, %c0_9] : memref<8x1xf32, #tpu.memory_space<vmem>>, vector<8x1xf32>
    %12 = vector.broadcast %11 : vector<8x1xf32> to vector<8x128xf32>
    %13 = arith.addf %10, %12 : vector<8x128xf32>
    %c0_10 = arith.constant 0 : index
    %c0_11 = arith.constant 0 : index
    %14 = vector.load %arg6[%c0_10, %c0_11] : memref<8x128xf32, #tpu.memory_space<vmem>>, vector<8x128xf32>
    tpu.vector_store %arg6[%c0_10, %c0_11], %13 {strides = array<i32>} : memref<8x128xf32, #tpu.memory_space<vmem>>, vector<8x128xf32>,
    return
  }
  func.func @transform_0(%arg0: i32) -> (i32, i32) {
    %c0_i32 = arith.constant 0 : i32
    %c0_i32_0 = arith.constant 0 : i32
    return %c0_i32, %arg0 : i32, i32
  }
  func.func @transform_1(%arg0: i32) -> (i32, i32) {
    %c0_i32 = arith.constant 0 : i32
    %c0_i32_0 = arith.constant 0 : i32
    return %c0_i32, %arg0 : i32, i32
  }
  func.func @transform_2(%arg0: i32) -> (i32, i32) {
    %c0_i32 = arith.constant 0 : i32
    %c0_i32_0 = arith.constant 0 : i32
    %c0_i32_1 = arith.constant 0 : i32
    return %c0_i32, %c0_i32_0 : i32, i32
  }
  func.func @transform_3(%arg0: i32) -> (i32, i32) {
    %c0_i32 = arith.constant 0 : i32
    %c0_i32_0 = arith.constant 0 : i32
    %c0_i32_1 = arith.constant 0 : i32
    return %c0_i32, %c0_i32_0 : i32, i32
  }
  func.func @transform_4(%arg0: i32) -> (i32, i32) {
    %c0_i32 = arith.constant 0 : i32
    %c0_i32_0 = arith.constant 0 : i32
    %c0_i32_1 = arith.constant 0 : i32
    return %c0_i32, %c0_i32_0 : i32, i32
  }
  func.func @transform_5(%arg0: i32) -> (i32, i32) {
    %c0_i32 = arith.constant 0 : i32
    %c0_i32_0 = arith.constant 0 : i32
    return %c0_i32, %arg0 : i32, i32
  }
}

</mosaic_0001>

<bundles_post_ra>
// kernel: tpu_custom_call.1
= control target key start
LH: loop header
LB: loop body
LE: loop exit
PB: predicated region body
PF: predicated region fallthrough
CT: control target
= control target key end

     0   :  { %10 = vsyncpa [#allocation3], 0  ;;  %s995_s0 = inlined_call_operand.vmem [shape: s32[8,128], index: 0, kind: input, shape index: {}]   ;;  %s996_s1 = inlined_call_operand.vmem [shape: f32[1,128], index: 1, kind: input, shape index: {}]   ;;  %s997_s2 = inlined_call_operand.hbm [shape: f32[32,128], index: 2, kind: input, shape index: {}]   ;;  %s998_s3 = inlined_call_operand.hbm [shape: f32[8,32], index: 3, kind: input, shape index: {}]   ;;  %s999_s4 = inlined_call_operand.vmem [shape: f32[8,1], index: 4, kind: input, shape index: {}]   ;;  %s1000_s5 = inlined_call_operand.hbm [shape: f32[8,128], index: 5, kind: output, shape index: {}]  }
   0x1   :  { %11 = vsyncpa [#allocation6], 0 }
   0x2   :  { %12 = vsyncpa [#allocation4], 0  ;;  %s21_s20 = sshll.u32 %s997_s2, 4  ;;  %s711_s21 = smov [#allocation2]   ;;  %s22_s20 = int_to_ptr.hbm [resolvable:$true] %s21_s20 }
   0x3   :  { %s23_s22 = sshll.u32 %s711_s21, 4  ;;  %s35_s25 = sshll.u32 %s998_s3, 4  ;;  %s24_s22 = int_to_ptr.vmem [resolvable:$true] %s23_s22  ;;  %s36_s25 = int_to_ptr.hbm [resolvable:$true] %s35_s25 }
   0x4   :  { %s712_s26 = smov 128   ;;  %s713_s27 = smov 8  }
   0x5   :  { %29 = dma.hbm_to_vmem [thread:$0]  %s22_s20, 512, %s24_s22, [#allocation3], %s712_s26, %s712_s26, %s713_s27  }
   0x6   :  { %s714_s28 = smov [#allocation5]  }
   0x7   :  { %s37_s29 = sshll.u32 %s714_s28, 4  ;;  %s38_s29 = int_to_ptr.vmem [resolvable:$true] %s37_s29 }
   0x8   :  { %40 = dma.hbm_to_vmem [thread:$0]  %s36_s25, 128, %s38_s29, [#allocation6]  }
   0x9   :  { %637 = dma.done.wait [#allocation3], 512  }
   0xa   :  { %638 = vsyncadd [#allocation3], 4294966784 }
   0xb   :  { %639 = dma.done.wait [#allocation6], 128  }
   0xc   :  { %640 = vsyncadd [#allocation6], 4294967168  ;;  %v51_v0 = vlaneseq  ;;  %v801_v17 = vmov 0.0   ;;  %v803_v18 = vmov 0.0   ;;  %v805_v19 = vmov 0.0   ;;  %s833_s2 = smov 0  }
   0xd   :  { %v807_v20 = vmov 0.0   ;;  %v809_v21 = vmov 0.0   ;;  %v811_v22 = vmov 0.0   ;;  %v813_v23 = vmov 0.0  }
   0xe   :  { %v754_v1 = vshrl.u32 %v51_v0, 7  ;;  %v815_v24 = vmov 0.0   ;;  %v817_v25 = vmov 0.0   ;;  %v819_v26 = vmov 0.0  }
   0xf   :  { %v821_v27 = vmov 0.0   ;;  %v823_v28 = vmov 0.0   ;;  %v825_v29 = vmov 0.0   ;;  %v827_v30 = vmov 0.0  }
  0x10   :  { %v757_v2 = vadd.s32 8, %v754_v1  ;;  %v760_v3 = vadd.s32 16, %v754_v1  ;;  %v763_v4 = vadd.s32 24, %v754_v1  ;;  %v766_v5 = vadd.s32 32, %v754_v1 }
  0x11   :  { %v769_v6 = vadd.s32 40, %v754_v1  ;;  %v772_v7 = vadd.s32 48, %v754_v1  ;;  %v775_v8 = vadd.s32 56, %v754_v1  ;;  %v778_v9 = vadd.s32 64, %v754_v1 }
  0x12   :  { %v781_v10 = vadd.s32 72, %v754_v1  ;;  %v784_v11 = vadd.s32 80, %v754_v1  ;;  %v787_v12 = vadd.s32 88, %v754_v1  ;;  %v790_v13 = vadd.s32 96, %v754_v1 }
  0x13   :  { %v793_v14 = vadd.s32 104, %v754_v1  ;;  %v796_v15 = vadd.s32 112, %v754_v1  ;;  %v799_v16 = vadd.s32 120, %v754_v1  ;;  %v829_v31 = vmov 0.0  }
  0x14   :  { %v831_v32 = vmov 0.0  }
  0x15 LB: > { %s90_s6 = scalar_lea.vmem %s995_s0, %s709_s2  ;;  %v715_v34 = vmov 0.0   ;;  %s73_s2 = sadd.s32 1, %s709_s2   ;;  %s709_s2 = sphi %s833_s2, %s73_s2   ;;  %v705_v32 = vphi %v831_v32, %v1022_v32   ;;  %v701_v31 = vphi %v829_v31, %v1021_v31   ;;  %v697_v30 = vphi %v827_v30, %v1020_v30   ;;  %v693_v29 = vphi %v825_v29, %v1019_v29   ;;  %v689_v28 = vphi %v823_v28, %v1018_v28   ;;  %v685_v27 = vphi %v821_v27, %v1017_v27   ;;  %v681_v26 = vphi %v819_v26, %v1016_v26   ;;  %v677_v25 = vphi %v817_v25, %v1015_v25   ;;  %v673_v24 = vphi %v815_v24, %v1014_v24   ;;  %v669_v23 = vphi %v813_v23, %v1013_v23   ;;  %v665_v22 = vphi %v811_v22, %v1012_v22   ;;  %v661_v21 = vphi %v809_v21, %v1011_v21   ;;  %v657_v20 = vphi %v807_v20, %v1010_v20   ;;  %v653_v19 = vphi %v805_v19, %v1009_v19   ;;  %v649_v18 = vphi %v803_v18, %v1008_v18   ;;  %v645_v17 = vphi %v801_v17, %v1007_v17  }
  0x16   : > { %v494_v33 = vld [vmem:[%s90_s6] ss:$0 sm:$0xff]  ;;  %p926_p0 = scmp.ge.s32.totalorder %s73_s2, 8  }
  0x17   : > { %vm93_vm0 = vcmp.eq.s32.totalorder %v494_v33, %v754_v1  ;;  %vm94_vm1 = vcmp.eq.s32.totalorder %v494_v33, %v757_v2  ;;  %vm95_vm2 = vcmp.eq.s32.totalorder %v494_v33, %v760_v3  ;;  %vm96_vm3 = vcmp.eq.s32.totalorder %v494_v33, %v763_v4  ;;  %v159_v1 = vld [vmem:[#allocation2 + $0x10] sm:$0xff] (%p926_p0)  ;;  %v158_v2 = vld [vmem:[#allocation2 + $0x8] sm:$0xff] (%p926_p0)  ;;  %v157_v3 = vld [vmem:[#allocation2] sm:$0xff] (%p926_p0) }
  0x18   : > { %vm97_vm4 = vcmp.eq.s32.totalorder %v494_v33, %v766_v5  ;;  %vm98_vm5 = vcmp.eq.s32.totalorder %v494_v33, %v769_v6  ;;  %vm99_vm6 = vcmp.eq.s32.totalorder %v494_v33, %v772_v7  ;;  %vm100_vm7 = vcmp.eq.s32.totalorder %v494_v33, %v775_v8  ;;  %v160_v4 = vld [vmem:[#allocation2 + $0x18] sm:$0xff] (%p926_p0)  ;;  %v199_v5 = vld [vmem:[%s999_s4] sm:$0xff] (%p926_p0)  ;;  %s717_s4 = smov (%p926_p0), [#allocation7]  }
  0x19   : > { %vm101_vm8 = vcmp.eq.s32.totalorder %v494_v33, %v778_v9  ;;  %vm102_vm9 = vcmp.eq.s32.totalorder %v494_v33, %v781_v10  ;;  %vm103_vm10 = vcmp.eq.s32.totalorder %v494_v33, %v784_v11  ;;  %vm104_vm11 = vcmp.eq.s32.totalorder %v494_v33, %v787_v12  ;;  %v496_v8 = vld [vmem:[%s996_s1] ss:$0 sm:$0xff] (%p926_p0)  ;;  %s235_s11 = sshll.u32 (%p926_p0), %s717_s4, 4  ;;  %s237_s1 = sshll.u32 (%p926_p0), %s1000_s5, 4  ;;  %s236_s11 = int_to_ptr.vmem [resolvable:$true] %s235_s11  ;;  %s238_s1 = int_to_ptr.hbm [resolvable:$true] %s237_s1 }
  0x1a   : > { %vm105_vm12 = vcmp.eq.s32.totalorder %v494_v33, %v790_v13  ;;  %vm106_vm13 = vcmp.eq.s32.totalorder %v494_v33, %v793_v14  ;;  %vm107_vm14 = vcmp.eq.s32.totalorder %v494_v33, %v796_v15  ;;  %vm108_vm15 = vcmp.eq.s32.totalorder %v494_v33, %v799_v16  ;;  %v198_v16 = vld [vmem:[#allocation5] sm:$0xff] (%p926_p0) }
  0x1b   : > { %v302_v35 = vsel %vm93_vm0, 1.0, %v715_v34  ;;  %v303_v36 = vsel %vm94_vm1, 1.0, %v715_v34  ;;  %v304_v37 = vsel %vm95_vm2, 1.0, %v715_v34  ;;  %v305_v38 = vsel %vm96_vm3, 1.0, %v715_v34 }
  0x1c   : > { %v306_v39 = vsel %vm97_vm4, 1.0, %v715_v34  ;;  %v307_v40 = vsel %vm98_vm5, 1.0, %v715_v34  ;;  %v308_v41 = vsel %vm99_vm6, 1.0, %v715_v34  ;;  %v309_v42 = vsel %vm100_vm7, 1.0, %v715_v34 }
  0x1d   : > { %v310_v43 = vsel %vm101_vm8, 1.0, %v715_v34  ;;  %v311_v44 = vsel %vm102_vm9, 1.0, %v715_v34  ;;  %v312_v45 = vsel %vm103_vm10, 1.0, %v715_v34  ;;  %v313_v46 = vsel %vm104_vm11, 1.0, %v715_v34 }
  0x1e   : > { %v314_v47 = vsel %vm105_vm12, 1.0, %v715_v34  ;;  %v315_v48 = vsel %vm106_vm13, 1.0, %v715_v34  ;;  %v316_v49 = vsel %vm107_vm14, 1.0, %v715_v34  ;;  %v317_v50 = vsel %vm108_vm15, 1.0, %v715_v34 }
  0x1f   : > { %v912_v32 = vadd.f32 %v705_v32, %v302_v35   ;;  %v914_v31 = vadd.f32 %v701_v31, %v303_v36   ;;  %v916_v30 = vadd.f32 %v697_v30, %v304_v37   ;;  %v918_v29 = vadd.f32 %v693_v29, %v305_v38  }
  0x20   : > { %v920_v28 = vadd.f32 %v689_v28, %v306_v39   ;;  %v146_v56 = vadd.f32 %v685_v27, %v307_v40   ;;  %v147_v57 = vadd.f32 %v681_v26, %v308_v41   ;;  %v148_v58 = vadd.f32 %v677_v25, %v309_v42  }
  0x21   : > { %v1001_v51 = vmov %v912_v32  ;;  %v1002_v52 = vmov %v914_v31  ;;  %v1003_v53 = vmov %v916_v30  ;;  %v1004_v54 = vmov %v918_v29 }
  0x22   : > { %v1005_v55 = vmov %v920_v28  ;;  %v149_v59 = vadd.f32 %v673_v24, %v310_v43   ;;  %v150_v60 = vadd.f32 %v669_v23, %v311_v44   ;;  %v151_v61 = vadd.f32 %v665_v22, %v312_v45  }
  0x23   : > { %v152_v62 = vadd.f32 %v661_v21, %v313_v46   ;;  %v153_v63 = vadd.f32 %v657_v20, %v314_v47   ;;  %v154_v0 = vadd.f32 %v653_v19, %v315_v48   ;;  %v155_v33 = vadd.f32 %v649_v18, %v316_v49  }
  0x24   : > { %v156_v34 = vadd.f32 %v645_v17, %v317_v50   ;;  %v1012_v22 = vmov %v151_v61  ;;  %v1013_v23 = vmov %v150_v60  ;;  %v1014_v24 = vmov %v149_v59  ;;  %72 = sbr.rel (!%p926_p0) target bundleno = 21 (0x15), region = 56 }
  0x25   : > { %v1008_v18 = vmov %v155_v33  ;;  %v1009_v19 = vmov %v154_v0  ;;  %v1010_v20 = vmov %v153_v63  ;;  %v1011_v21 = vmov %v152_v62 }
  0x26   : > { %v1007_v17 = vmov %v156_v34  ;;  %v1015_v25 = vmov %v148_v58  ;;  %v1016_v26 = vmov %v147_v57  ;;  %v1017_v27 = vmov %v146_v56  ;;  %320 = vmatpush.msra.mxu3 (%p926_p0), %v156_v34  ;;  %319 = vmatpush.msra.mxu2 (%p926_p0), %v156_v34 }
  0x27   : > { %v1018_v28 = vmov %v1005_v55  ;;  %v1019_v29 = vmov %v1004_v54  ;;  %v1020_v30 = vmov %v1003_v53  ;;  %v1021_v31 = vmov %v1002_v52  ;;  %161 = vmatpush.msra.mxu0 (%p926_p0), %v156_v34 }
  0x28   : > { %v1022_v32 = vmov %v1001_v51  ;;  %322 = vmatpush.msra.mxu3 (%p926_p0), %v155_v33  ;;  %321 = vmatpush.msra.mxu2 (%p926_p0), %v155_v33  ;;  %v716_v6 = vmov (%p926_p0), 0   ;;  %vm205_vm0 = vcmask (%p926_p0), 261120  }
  0x29   :  { %162 = vmatpush.msra.mxu0 %v155_v33  ;;  %495 = vset.pattern.permute.xlu0 %v716_v6 }
  0x2a   :  { %324 = vmatpush.msra.mxu3 %v154_v0  ;;  %323 = vmatpush.msra.mxu2 %v154_v0 }
  0x2b   :  { %163 = vmatpush.msra.mxu0 %v154_v0  ;;  %202 = vperm.xlu0 %495, %v199_v5  }
  0x2c   :  { %326 = vmatpush.msra.mxu3 %v153_v63  ;;  %325 = vmatpush.msra.mxu2 %v153_v63 }
  0x2d   :  { %164 = vmatpush.msra.mxu0 %v153_v63 }
  0x2e   :  { %328 = vmatpush.msra.mxu3 %v152_v62  ;;  %327 = vmatpush.msra.mxu2 %v152_v62 }
  0x2f   :  { %165 = vmatpush.msra.mxu0 %v152_v62 }
  0x30   :  { %330 = vmatpush.msra.mxu3 %v151_v61  ;;  %329 = vmatpush.msra.mxu2 %v151_v61 }
  0x31   :  { %166 = vmatpush.msra.mxu0 %v151_v61 }
  0x32   :  { %332 = vmatpush.msra.mxu3 %v150_v60  ;;  %331 = vmatpush.msra.mxu2 %v150_v60 }
  0x33   :  { %167 = vmatpush.msra.mxu0 %v150_v60 }
  0x34   :  { %334 = vmatpush.msra.mxu3 %v149_v59  ;;  %333 = vmatpush.msra.mxu2 %v149_v59 }
  0x35   :  { %168 = vmatpush.msra.mxu0 %v149_v59 }
  0x36   :  { %336 = vmatpush.msra.mxu3 %v148_v58  ;;  %335 = vmatpush.msra.mxu2 %v148_v58 }
  0x37   :  { %169 = vmatpush.msra.mxu0 %v148_v58 }
  0x38   :  { %338 = vmatpush.msra.mxu3 %v147_v57  ;;  %337 = vmatpush.msra.mxu2 %v147_v57 }
  0x39   :  { %170 = vmatpush.msra.mxu0 %v147_v57 }
  0x3a   :  { %340 = vmatpush.msra.mxu3 %v146_v56  ;;  %339 = vmatpush.msra.mxu2 %v146_v56 }
  0x3b   :  { %171 = vmatpush.msra.mxu0 %v146_v56 }
  0x3c   :  { %342 = vmatpush.msra.mxu3 %v1005_v55  ;;  %341 = vmatpush.msra.mxu2 %v1005_v55 }
  0x3d   :  { %172 = vmatpush.msra.mxu0 %v1005_v55 }
  0x3e   :  { %344 = vmatpush.msra.mxu3 %v1004_v54  ;;  %343 = vmatpush.msra.mxu2 %v1004_v54 }
  0x3f   :  { %173 = vmatpush.msra.mxu0 %v1004_v54 }
  0x40   :  { %346 = vmatpush.msra.mxu3 %v1003_v53  ;;  %345 = vmatpush.msra.mxu2 %v1003_v53 }
  0x41   :  { %174 = vmatpush.msra.mxu0 %v1003_v53 }
  0x42   :  { %348 = vmatpush.msra.mxu3 %v1002_v52  ;;  %347 = vmatpush.msra.mxu2 %v1002_v52 }
  0x43   :  { %175 = vmatpush.msra.mxu0 %v1002_v52 }
  0x44   :  { %350 = vmatpush.msra.mxu3 %v1001_v51  ;;  %349 = vmatpush.msra.mxu2 %v1001_v51 }
  0x45   :  { %183 = vmatmul.f32.vlgmr.msra.gmra.mxu3 %v159_v1  ;;  %180 = vmatmul.f32.vlgmr.msra.gmra.mxu2 %v158_v2 }
  0x46   :  { %176 = vmatpush.msra.mxu0 %v1001_v51 }
  0x47   :  { %177 = vmatmul.f32.vlgmr.msra.gmra.mxu0 %v157_v3 }
  0x4d   :  { %186 = vmatmul.f32.gmra.mxu3 %v160_v4 }
  0x9d   :  { %v203_v17 = vpop.permute.xlu0 %202 }
  0xc4   :  { %v178_v12 = vpop.f32.mrf.mxu0 }
  0xc5   :  { %v194_v15 = vmul.f32 %v496_v8, %v178_v12 }
  0xc8   :  { %v184_v7 = vpop.f32.mrf.mxu3  ;;  %v181_v10 = vpop.f32.mrf.mxu2 }
  0xc9   :  { %v196_v13 = vmul.f32 %v496_v8, %v184_v7  ;;  %v195_v14 = vmul.f32 %v496_v8, %v181_v10 }
  0xd0   :  { %v187_v9 = vpop.f32.mrf.mxu3 }
  0xd1   :  { %v197_v11 = vmul.f32 %v496_v8, %v187_v9 }
  0xd3   :  { %221 = vmatpush.msra.mxu1 %v197_v11 }
  0xd5   :  { %222 = vmatpush.msra.mxu1 %v196_v13 }
  0xd7   :  { %223 = vmatpush.msra.mxu1 %v195_v14 }
  0xd9   :  { %224 = vmatpush.msra.mxu1 %v194_v15 }
  0xda   :  { %318 = vmatmul.msk.f32.vlgmr.msra.gmra.mxu1 %vm205_vm0, %v198_v16 }
 0x157   :  { %v226_v18 = vpop.f32.mrf.mxu1 }
 0x158   :  { %v227_v19 = vadd.f32 %v226_v18, %v203_v17 }
 0x15a   :  { %229 = vst [vmem:[#allocation7] sm:$0xff] %v227_v19 }
 0x15b   :  { %240 = dma.vmem_to_hbm [thread:$0]  %s236_s11, 128, %s238_s1, [#allocation4]  }
 0x15c   :  { %641 = dma.done.wait [#allocation4], 128  }
 0x15d   :  { %642 = vsyncadd [#allocation4], 4294967168 }
 0x15e   :  { %245 = vsyncpa [#allocation3], 1 }
 0x15f   :  { %246 = vsyncpa [#allocation6], 1 }
 0x160   :  { %247 = vsyncpa [#allocation4], 1 }

</bundles_post_ra>
